<compile_context>
chip_gen: v7x
topology: tpu7x:2x2x1
jax: 0.10.0
libtpu: 0.0.40
codegen_flags: <defaults>
</compile_context>

<pallas_src>
import jax
import jax.numpy as jnp
from jax.experimental import pallas as pl
from jax.experimental.pallas import tpu as pltpu

LN_EPS = 1e-5  # torch.nn.LayerNorm default eps


# ----------------------------------------------------------------------------
# Kernel 1: sn = LayerNorm(Embedding(z)), computed once per batch element.
# ----------------------------------------------------------------------------
def embed_ln_kernel(z_ref, emb_ref, gamma_ref, beta_ref, sn_ref):
    # z_ref    : (1, N, 1) int32
    # emb_ref  : (max_z, H) f32
    # gamma/beta_ref : (1, H) f32   (ones/zeros == elementwise_affine=False)
    # sn_ref   : (1, N, H) f32 (output)
    z = z_ref[0]                                          # (N, 1) int32
    max_z, H = emb_ref.shape
    N = z.shape[0]

    # Exact unrolled select-gather (bit-exact vs emb_table[z], no MXU rounding).
    # z outside [0, max_z) maps to a zero row (padding_idx-like behaviour).
    e = jnp.zeros((N, H), jnp.float32)
    for k in range(max_z):                                # max_z is small (atomic numbers)
        sel = (z == k).astype(jnp.float32)                # (N, 1)
        e = e + sel * emb_ref[k:k + 1, :]                 # (N,1)*(1,H) -> (N,H)

    # LayerNorm over hid_dim
    mean = jnp.mean(e, axis=-1, keepdims=True)
    cen = e - mean
    var = jnp.mean(cen * cen, axis=-1, keepdims=True)
    y = cen * jax.lax.rsqrt(var + LN_EPS)
    sn_ref[...] = (y * gamma_ref[...] + beta_ref[...])[None, :, :]


# ----------------------------------------------------------------------------
# Kernel 2: out = s + sum_j mask[:, i, j, :] * sn[:, j, :]   (CFConv + residual)
# ----------------------------------------------------------------------------
def cfconv_kernel(s_ref, sn_ref, mask_ref, o_ref, acc_ref):
    # Block shapes per grid step (b, i, j):
    #   s_ref    : (1, ti, H)       (output rows of this i tile)
    #   sn_ref   : (1, tj, H) f32   (LN(Embedding(z)) rows of this j tile)
    #   mask_ref : (1, ti, tj, H)   (i tile x neighbor j tile)
    #   o_ref    : (1, ti, H)
    # scratch:
    #   acc_ref  : (ti, H) f32      (accumulator, also carries the residual s)
    j = pl.program_id(2)
    nj = pl.num_programs(2)
    _, ti, tj, H = mask_ref.shape

    @pl.when(j == 0)
    def _init():
        acc_ref[...] = s_ref[0].astype(jnp.float32)

    CH = 8                       # one f32 sublane group per chunk
    n_full = tj // CH
    tail = tj - n_full * CH

    def chunk_sum(start, size):
        m_c = mask_ref[0, :, pl.ds(start, size), :].astype(jnp.float32)  # (ti, size, H)
        sn_c = sn_ref[0, pl.ds(start, size), :]                          # (size, H)
        return jnp.sum(m_c * sn_c[None, :, :], axis=1)                   # (ti, H)

    acc = acc_ref[...]

    if n_full > 0:
        if n_full <= 8:
            # Few chunks: static unroll (small code, proven lowering path).
            for c in range(n_full):
                acc = acc + chunk_sum(c * CH, CH)
        else:
            # Many chunks: rolled loop bounds live ranges / code size.
            def body(c, a):
                start = pl.multiple_of(c * CH, CH)
                return a + chunk_sum(start, CH)
            acc = jax.lax.fori_loop(0, n_full, body, acc, unroll=8)

    if tail > 0:
        acc = acc + chunk_sum(n_full * CH, tail)

    acc_ref[...] = acc

    @pl.when(j == nj - 1)
    def _store():
        o_ref[...] = acc_ref[...][None, :, :].astype(o_ref.dtype)


# ----------------------------------------------------------------------------
# Wrapper
# ----------------------------------------------------------------------------
def _pick_tile(n, cap):
    """Largest multiple-of-8 divisor of n that is <= cap, else the full dim n
    (full-extent blocks are always legal w.r.t. the (8,128) constraint)."""
    cap = max(1, min(n, cap))
    for d in range(cap, 0, -1):
        if n % d == 0 and d % 8 == 0:
            return d
    return n


def neighbor_emb(z, s, mask, emb_table, gamma=None, beta=None):
    """NeighborEmb forward. z: (B,N) int, s: (B,N,H), mask: (B,N,N,H) (f32 or bf16)."""
    B, N, H = s.shape
    max_z = emb_table.shape[0]
    if gamma is None:
        gamma = jnp.ones((H,), jnp.float32)   # ln_learnable=False -> no affine
    if beta is None:
        beta = jnp.zeros((H,), jnp.float32)

    z3 = z.astype(jnp.int32).reshape(B, N, 1)
    gamma2 = gamma.reshape(1, H).astype(jnp.float32)
    beta2 = beta.reshape(1, H).astype(jnp.float32)
    emb_table = emb_table.astype(jnp.float32)

    # ---- Pass 1: sn = LN(Embedding(z)), once per batch element ---------------
    sn = pl.pallas_call(
        embed_ln_kernel,
        out_shape=jax.ShapeDtypeStruct((B, N, H), jnp.float32),
        grid_spec=pltpu.PrefetchScalarGridSpec(
            num_scalar_prefetch=0,
            grid=(B,),
            in_specs=[
                pl.BlockSpec((1, N, 1), lambda b: (b, 0, 0)),      # z
                pl.BlockSpec((max_z, H), lambda b: (0, 0)),        # emb table
                pl.BlockSpec((1, H), lambda b: (0, 0)),            # LN gamma
                pl.BlockSpec((1, H), lambda b: (0, 0)),            # LN beta
            ],
            out_specs=pl.BlockSpec((1, N, H), lambda b: (b, 0, 0)),
        ),
        compiler_params=pltpu.CompilerParams(
            dimension_semantics=("parallel",),
        ),
    )(z3, emb_table, gamma2, beta2)

    # ---- Pass 2: CFConv + residual, streaming bounded mask tiles --------------
    # Tile selection: output-row tile <= 128, mask tile bounded to ~4 MiB so the
    # double-buffered blocks fit every generation and the DMA is hidden behind
    # the VPU work.
    ti = _pick_tile(N, 128)
    mask_item = mask.dtype.itemsize
    tile_budget = 4 * 1024 * 1024
    tj_cap = max(1, tile_budget // max(1, ti * H * mask_item))
    tj = _pick_tile(N, tj_cap)

    s_item = s.dtype.itemsize
    est = (2 * ti * tj * H * mask_item      # mask tile (double-buffered)
           + 2 * tj * H * 4                 # sn tile
           + 2 * ti * H * s_item            # s tile
           + 2 * ti * H * s_item            # out tile
           + ti * H * 4)                    # acc scratch
    vmem_limit = int(min(max(2 * est, 16 * 1024 * 1024), 48 * 1024 * 1024))

    grid = (B, N // ti, N // tj)

    return pl.pallas_call(
        cfconv_kernel,
        out_shape=jax.ShapeDtypeStruct((B, N, H), s.dtype),
        grid_spec=pltpu.PrefetchScalarGridSpec(
            num_scalar_prefetch=0,
            grid=grid,
            in_specs=[
                pl.BlockSpec((1, ti, H), lambda b, i, j: (b, i, 0)),          # s
                pl.BlockSpec((1, tj, H), lambda b, i, j: (b, j, 0)),          # sn
                pl.BlockSpec((1, ti, tj, H), lambda b, i, j: (b, i, j, 0)),   # mask tile
            ],
            out_specs=pl.BlockSpec((1, ti, H), lambda b, i, j: (b, i, 0)),
            scratch_shapes=[
                pltpu.VMEM((ti, H), jnp.float32),   # CFConv accumulator
            ],
        ),
        compiler_params=pltpu.CompilerParams(
            dimension_semantics=("parallel", "parallel", "arbitrary"),
            vmem_limit_bytes=vmem_limit,
        ),
    )(s, sn, mask)


if __name__ == "__main__":
    # Small shapes consistent with the module: batch=2, atoms=8, hid_dim=32, max_z=20
    B, N, H, MAX_Z = 2, 8, 32, 20

    key = jax.random.PRNGKey(0)
    k1, k2, k3, k4 = jax.random.split(key, 4)
    z = jax.random.randint(k1, (B, N), 0, MAX_Z)                  # atomic numbers
    s = jax.random.normal(k2, (B, N, H), jnp.float32)             # node features
    mask = jax.random.normal(k3, (B, N, N, H), jnp.float32)       # neighbor mask

    # Synthetic parameters matching the module's shapes:
    # nn.Embedding(max_z, hid_dim, padding_idx=0): N(0,1) with row 0 zeroed.
    emb_table = jax.random.normal(k4, (MAX_Z, H), jnp.float32).at[0].set(0.0)
    # GNNLF uses LayerNorm(elementwise_affine=False): gamma=1, beta=0.
    gamma = jnp.ones((H,), jnp.float32)
    beta = jnp.zeros((H,), jnp.float32)

    out = neighbor_emb(z, s, mask, emb_table, gamma, beta)
    out = jax.block_until_ready(out)

    # Pure-JAX reference for a correctness sanity check.
    sn_ref = emb_table[z]                                          # (B, N, H)
    mean = sn_ref.mean(-1, keepdims=True)
    var = ((sn_ref - mean) ** 2).mean(-1, keepdims=True)
    sn_ref = (sn_ref - mean) / jnp.sqrt(var + LN_EPS) * gamma + beta
    ref = s + jnp.sum(mask * sn_ref[:, None, :, :], axis=2)

    assert out.shape == (B, N, H) and out.dtype == jnp.float32
    assert jnp.allclose(out, ref, atol=1e-4, rtol=1e-4), "mismatch vs reference"
    print("KERNEL_OK")

    # TODO(synk): the rest of GNNLF (Mol2Graph/RBF edge features, dir_proj MLPs,
    # DirCFConv interaction stack, output heads) is outside this kernel's scope.
</pallas_src>

<mosaic_0001>
module attributes {stable_mosaic.version = 11 : i64} {
  func.func @embed_ln_kernel(%arg0: i32, %arg1: memref<1x8x1xi32, #tpu.memory_space<vmem>>, %arg2: memref<20x32xf32, #tpu.memory_space<vmem>>, %arg3: memref<1x32xf32, #tpu.memory_space<vmem>>, %arg4: memref<1x32xf32, #tpu.memory_space<vmem>>, %arg5: memref<1x8x32xf32, #tpu.memory_space<vmem>>) attributes {dimension_semantics = [#tpu.dimension_semantics<parallel>], iteration_bounds = array<i64: 2>, scalar_prefetch = 0 : i64, scratch_operands = 0 : i64, tpu.core_type = #tpu.core_type<tc>, window_params = [{transform_indices = @transform_0, window_bounds = array<i64: 1, 8, 1>}, {pipeline_mode = #tpu.pipeline_mode<synchronous>, transform_indices = @transform_1, window_bounds = array<i64: 20, 32>}, {pipeline_mode = #tpu.pipeline_mode<synchronous>, transform_indices = @transform_2, window_bounds = array<i64: 1, 32>}, {pipeline_mode = #tpu.pipeline_mode<synchronous>, transform_indices = @transform_3, window_bounds = array<i64: 1, 32>}, {transform_indices = @transform_4, window_bounds = array<i64: 1, 8, 32>}]} {
    %c0 = arith.constant 0 : index
    %c0_0 = arith.constant 0 : index
    %c0_1 = arith.constant 0 : index
    %0 = vector.load %arg1[%c0, %c0_0, %c0_1] : memref<1x8x1xi32, #tpu.memory_space<vmem>>, vector<1x8x1xi32>
    %1 = vector.shape_cast %0 : vector<1x8x1xi32> to vector<8x1xi32>
    %cst = arith.constant 0.000000e+00 : f32
    %2 = vector.broadcast %cst : f32 to vector<8x32xf32>
    %c0_i32 = arith.constant 0 : i32
    %3 = vector.broadcast %c0_i32 : i32 to vector<8x1xi32>
    %4 = arith.cmpi eq, %1, %3 : vector<8x1xi32>
    %5 = arith.extui %4 : vector<8x1xi1> to vector<8x1xi32>
    %6 = arith.sitofp %5 : vector<8x1xi32> to vector<8x1xf32>
    %c0_2 = arith.constant 0 : index
    %c0_3 = arith.constant 0 : index
    %7 = vector.load %arg2[%c0_2, %c0_3] : memref<20x32xf32, #tpu.memory_space<vmem>>, vector<1x32xf32>
    %8 = vector.broadcast %6 : vector<8x1xf32> to vector<8x32xf32>
    %9 = vector.broadcast %7 : vector<1x32xf32> to vector<8x32xf32>
    %10 = arith.mulf %8, %9 : vector<8x32xf32>
    %11 = arith.addf %2, %10 : vector<8x32xf32>
    %c1_i32 = arith.constant 1 : i32
    %12 = vector.broadcast %c1_i32 : i32 to vector<8x1xi32>
    %13 = arith.cmpi eq, %1, %12 : vector<8x1xi32>
    %14 = arith.extui %13 : vector<8x1xi1> to vector<8x1xi32>
    %15 = arith.sitofp %14 : vector<8x1xi32> to vector<8x1xf32>
    %c1 = arith.constant 1 : index
    %c0_4 = arith.constant 0 : index
    %16 = vector.load %arg2[%c1, %c0_4] : memref<20x32xf32, #tpu.memory_space<vmem>>, vector<1x32xf32>
    %17 = vector.broadcast %15 : vector<8x1xf32> to vector<8x32xf32>
    %18 = vector.broadcast %16 : vector<1x32xf32> to vector<8x32xf32>
    %19 = arith.mulf %17, %18 : vector<8x32xf32>
    %20 = arith.addf %11, %19 : vector<8x32xf32>
    %c2_i32 = arith.constant 2 : i32
    %21 = vector.broadcast %c2_i32 : i32 to vector<8x1xi32>
    %22 = arith.cmpi eq, %1, %21 : vector<8x1xi32>
    %23 = arith.extui %22 : vector<8x1xi1> to vector<8x1xi32>
    %24 = arith.sitofp %23 : vector<8x1xi32> to vector<8x1xf32>
    %c2 = arith.constant 2 : index
    %c0_5 = arith.constant 0 : index
    %25 = vector.load %arg2[%c2, %c0_5] : memref<20x32xf32, #tpu.memory_space<vmem>>, vector<1x32xf32>
    %26 = vector.broadcast %24 : vector<8x1xf32> to vector<8x32xf32>
    %27 = vector.broadcast %25 : vector<1x32xf32> to vector<8x32xf32>
    %28 = arith.mulf %26, %27 : vector<8x32xf32>
    %29 = arith.addf %20, %28 : vector<8x32xf32>
    %c3_i32 = arith.constant 3 : i32
    %30 = vector.broadcast %c3_i32 : i32 to vector<8x1xi32>
    %31 = arith.cmpi eq, %1, %30 : vector<8x1xi32>
    %32 = arith.extui %31 : vector<8x1xi1> to vector<8x1xi32>
    %33 = arith.sitofp %32 : vector<8x1xi32> to vector<8x1xf32>
    %c3 = arith.constant 3 : index
    %c0_6 = arith.constant 0 : index
    %34 = vector.load %arg2[%c3, %c0_6] : memref<20x32xf32, #tpu.memory_space<vmem>>, vector<1x32xf32>
    %35 = vector.broadcast %33 : vector<8x1xf32> to vector<8x32xf32>
    %36 = vector.broadcast %34 : vector<1x32xf32> to vector<8x32xf32>
    %37 = arith.mulf %35, %36 : vector<8x32xf32>
    %38 = arith.addf %29, %37 : vector<8x32xf32>
    %c4_i32 = arith.constant 4 : i32
    %39 = vector.broadcast %c4_i32 : i32 to vector<8x1xi32>
    %40 = arith.cmpi eq, %1, %39 : vector<8x1xi32>
    %41 = arith.extui %40 : vector<8x1xi1> to vector<8x1xi32>
    %42 = arith.sitofp %41 : vector<8x1xi32> to vector<8x1xf32>
    %c4 = arith.constant 4 : index
    %c0_7 = arith.constant 0 : index
    %43 = vector.load %arg2[%c4, %c0_7] : memref<20x32xf32, #tpu.memory_space<vmem>>, vector<1x32xf32>
    %44 = vector.broadcast %42 : vector<8x1xf32> to vector<8x32xf32>
    %45 = vector.broadcast %43 : vector<1x32xf32> to vector<8x32xf32>
    %46 = arith.mulf %44, %45 : vector<8x32xf32>
    %47 = arith.addf %38, %46 : vector<8x32xf32>
    %c5_i32 = arith.constant 5 : i32
    %48 = vector.broadcast %c5_i32 : i32 to vector<8x1xi32>
    %49 = arith.cmpi eq, %1, %48 : vector<8x1xi32>
    %50 = arith.extui %49 : vector<8x1xi1> to vector<8x1xi32>
    %51 = arith.sitofp %50 : vector<8x1xi32> to vector<8x1xf32>
    %c5 = arith.constant 5 : index
    %c0_8 = arith.constant 0 : index
    %52 = vector.load %arg2[%c5, %c0_8] : memref<20x32xf32, #tpu.memory_space<vmem>>, vector<1x32xf32>
    %53 = vector.broadcast %51 : vector<8x1xf32> to vector<8x32xf32>
    %54 = vector.broadcast %52 : vector<1x32xf32> to vector<8x32xf32>
    %55 = arith.mulf %53, %54 : vector<8x32xf32>
    %56 = arith.addf %47, %55 : vector<8x32xf32>
    %c6_i32 = arith.constant 6 : i32
    %57 = vector.broadcast %c6_i32 : i32 to vector<8x1xi32>
    %58 = arith.cmpi eq, %1, %57 : vector<8x1xi32>
    %59 = arith.extui %58 : vector<8x1xi1> to vector<8x1xi32>
    %60 = arith.sitofp %59 : vector<8x1xi32> to vector<8x1xf32>
    %c6 = arith.constant 6 : index
    %c0_9 = arith.constant 0 : index
    %61 = vector.load %arg2[%c6, %c0_9] : memref<20x32xf32, #tpu.memory_space<vmem>>, vector<1x32xf32>
    %62 = vector.broadcast %60 : vector<8x1xf32> to vector<8x32xf32>
    %63 = vector.broadcast %61 : vector<1x32xf32> to vector<8x32xf32>
    %64 = arith.mulf %62, %63 : vector<8x32xf32>
    %65 = arith.addf %56, %64 : vector<8x32xf32>
    %c7_i32 = arith.constant 7 : i32
    %66 = vector.broadcast %c7_i32 : i32 to vector<8x1xi32>
    %67 = arith.cmpi eq, %1, %66 : vector<8x1xi32>
    %68 = arith.extui %67 : vector<8x1xi1> to vector<8x1xi32>
    %69 = arith.sitofp %68 : vector<8x1xi32> to vector<8x1xf32>
    %c7 = arith.constant 7 : index
    %c0_10 = arith.constant 0 : index
    %70 = vector.load %arg2[%c7, %c0_10] : memref<20x32xf32, #tpu.memory_space<vmem>>, vector<1x32xf32>
    %71 = vector.broadcast %69 : vector<8x1xf32> to vector<8x32xf32>
    %72 = vector.broadcast %70 : vector<1x32xf32> to vector<8x32xf32>
    %73 = arith.mulf %71, %72 : vector<8x32xf32>
    %74 = arith.addf %65, %73 : vector<8x32xf32>
    %c8_i32 = arith.constant 8 : i32
    %75 = vector.broadcast %c8_i32 : i32 to vector<8x1xi32>
    %76 = arith.cmpi eq, %1, %75 : vector<8x1xi32>
    %77 = arith.extui %76 : vector<8x1xi1> to vector<8x1xi32>
    %78 = arith.sitofp %77 : vector<8x1xi32> to vector<8x1xf32>
    %c8 = arith.constant 8 : index
    %c0_11 = arith.constant 0 : index
    %79 = vector.load %arg2[%c8, %c0_11] : memref<20x32xf32, #tpu.memory_space<vmem>>, vector<1x32xf32>
    %80 = vector.broadcast %78 : vector<8x1xf32> to vector<8x32xf32>
    %81 = vector.broadcast %79 : vector<1x32xf32> to vector<8x32xf32>
    %82 = arith.mulf %80, %81 : vector<8x32xf32>
    %83 = arith.addf %74, %82 : vector<8x32xf32>
    %c9_i32 = arith.constant 9 : i32
    %84 = vector.broadcast %c9_i32 : i32 to vector<8x1xi32>
    %85 = arith.cmpi eq, %1, %84 : vector<8x1xi32>
    %86 = arith.extui %85 : vector<8x1xi1> to vector<8x1xi32>
    %87 = arith.sitofp %86 : vector<8x1xi32> to vector<8x1xf32>
    %c9 = arith.constant 9 : index
    %c0_12 = arith.constant 0 : index
    %88 = vector.load %arg2[%c9, %c0_12] : memref<20x32xf32, #tpu.memory_space<vmem>>, vector<1x32xf32>
    %89 = vector.broadcast %87 : vector<8x1xf32> to vector<8x32xf32>
    %90 = vector.broadcast %88 : vector<1x32xf32> to vector<8x32xf32>
    %91 = arith.mulf %89, %90 : vector<8x32xf32>
    %92 = arith.addf %83, %91 : vector<8x32xf32>
    %c10_i32 = arith.constant 10 : i32
    %93 = vector.broadcast %c10_i32 : i32 to vector<8x1xi32>
    %94 = arith.cmpi eq, %1, %93 : vector<8x1xi32>
    %95 = arith.extui %94 : vector<8x1xi1> to vector<8x1xi32>
    %96 = arith.sitofp %95 : vector<8x1xi32> to vector<8x1xf32>
    %c10 = arith.constant 10 : index
    %c0_13 = arith.constant 0 : index
    %97 = vector.load %arg2[%c10, %c0_13] : memref<20x32xf32, #tpu.memory_space<vmem>>, vector<1x32xf32>
    %98 = vector.broadcast %96 : vector<8x1xf32> to vector<8x32xf32>
    %99 = vector.broadcast %97 : vector<1x32xf32> to vector<8x32xf32>
    %100 = arith.mulf %98, %99 : vector<8x32xf32>
    %101 = arith.addf %92, %100 : vector<8x32xf32>
    %c11_i32 = arith.constant 11 : i32
    %102 = vector.broadcast %c11_i32 : i32 to vector<8x1xi32>
    %103 = arith.cmpi eq, %1, %102 : vector<8x1xi32>
    %104 = arith.extui %103 : vector<8x1xi1> to vector<8x1xi32>
    %105 = arith.sitofp %104 : vector<8x1xi32> to vector<8x1xf32>
    %c11 = arith.constant 11 : index
    %c0_14 = arith.constant 0 : index
    %106 = vector.load %arg2[%c11, %c0_14] : memref<20x32xf32, #tpu.memory_space<vmem>>, vector<1x32xf32>
    %107 = vector.broadcast %105 : vector<8x1xf32> to vector<8x32xf32>
    %108 = vector.broadcast %106 : vector<1x32xf32> to vector<8x32xf32>
    %109 = arith.mulf %107, %108 : vector<8x32xf32>
    %110 = arith.addf %101, %109 : vector<8x32xf32>
    %c12_i32 = arith.constant 12 : i32
    %111 = vector.broadcast %c12_i32 : i32 to vector<8x1xi32>
    %112 = arith.cmpi eq, %1, %111 : vector<8x1xi32>
    %113 = arith.extui %112 : vector<8x1xi1> to vector<8x1xi32>
    %114 = arith.sitofp %113 : vector<8x1xi32> to vector<8x1xf32>
    %c12 = arith.constant 12 : index
    %c0_15 = arith.constant 0 : index
    %115 = vector.load %arg2[%c12, %c0_15] : memref<20x32xf32, #tpu.memory_space<vmem>>, vector<1x32xf32>
    %116 = vector.broadcast %114 : vector<8x1xf32> to vector<8x32xf32>
    %117 = vector.broadcast %115 : vector<1x32xf32> to vector<8x32xf32>
    %118 = arith.mulf %116, %117 : vector<8x32xf32>
    %119 = arith.addf %110, %118 : vector<8x32xf32>
    %c13_i32 = arith.constant 13 : i32
    %120 = vector.broadcast %c13_i32 : i32 to vector<8x1xi32>
    %121 = arith.cmpi eq, %1, %120 : vector<8x1xi32>
    %122 = arith.extui %121 : vector<8x1xi1> to vector<8x1xi32>
    %123 = arith.sitofp %122 : vector<8x1xi32> to vector<8x1xf32>
    %c13 = arith.constant 13 : index
    %c0_16 = arith.constant 0 : index
    %124 = vector.load %arg2[%c13, %c0_16] : memref<20x32xf32, #tpu.memory_space<vmem>>, vector<1x32xf32>
    %125 = vector.broadcast %123 : vector<8x1xf32> to vector<8x32xf32>
    %126 = vector.broadcast %124 : vector<1x32xf32> to vector<8x32xf32>
    %127 = arith.mulf %125, %126 : vector<8x32xf32>
    %128 = arith.addf %119, %127 : vector<8x32xf32>
    %c14_i32 = arith.constant 14 : i32
    %129 = vector.broadcast %c14_i32 : i32 to vector<8x1xi32>
    %130 = arith.cmpi eq, %1, %129 : vector<8x1xi32>
    %131 = arith.extui %130 : vector<8x1xi1> to vector<8x1xi32>
    %132 = arith.sitofp %131 : vector<8x1xi32> to vector<8x1xf32>
    %c14 = arith.constant 14 : index
    %c0_17 = arith.constant 0 : index
    %133 = vector.load %arg2[%c14, %c0_17] : memref<20x32xf32, #tpu.memory_space<vmem>>, vector<1x32xf32>
    %134 = vector.broadcast %132 : vector<8x1xf32> to vector<8x32xf32>
    %135 = vector.broadcast %133 : vector<1x32xf32> to vector<8x32xf32>
    %136 = arith.mulf %134, %135 : vector<8x32xf32>
    %137 = arith.addf %128, %136 : vector<8x32xf32>
    %c15_i32 = arith.constant 15 : i32
    %138 = vector.broadcast %c15_i32 : i32 to vector<8x1xi32>
    %139 = arith.cmpi eq, %1, %138 : vector<8x1xi32>
    %140 = arith.extui %139 : vector<8x1xi1> to vector<8x1xi32>
    %141 = arith.sitofp %140 : vector<8x1xi32> to vector<8x1xf32>
    %c15 = arith.constant 15 : index
    %c0_18 = arith.constant 0 : index
    %142 = vector.load %arg2[%c15, %c0_18] : memref<20x32xf32, #tpu.memory_space<vmem>>, vector<1x32xf32>
    %143 = vector.broadcast %141 : vector<8x1xf32> to vector<8x32xf32>
    %144 = vector.broadcast %142 : vector<1x32xf32> to vector<8x32xf32>
    %145 = arith.mulf %143, %144 : vector<8x32xf32>
    %146 = arith.addf %137, %145 : vector<8x32xf32>
    %c16_i32 = arith.constant 16 : i32
    %147 = vector.broadcast %c16_i32 : i32 to vector<8x1xi32>
    %148 = arith.cmpi eq, %1, %147 : vector<8x1xi32>
    %149 = arith.extui %148 : vector<8x1xi1> to vector<8x1xi32>
    %150 = arith.sitofp %149 : vector<8x1xi32> to vector<8x1xf32>
    %c16 = arith.constant 16 : index
    %c0_19 = arith.constant 0 : index
    %151 = vector.load %arg2[%c16, %c0_19] : memref<20x32xf32, #tpu.memory_space<vmem>>, vector<1x32xf32>
    %152 = vector.broadcast %150 : vector<8x1xf32> to vector<8x32xf32>
    %153 = vector.broadcast %151 : vector<1x32xf32> to vector<8x32xf32>
    %154 = arith.mulf %152, %153 : vector<8x32xf32>
    %155 = arith.addf %146, %154 : vector<8x32xf32>
    %c17_i32 = arith.constant 17 : i32
    %156 = vector.broadcast %c17_i32 : i32 to vector<8x1xi32>
    %157 = arith.cmpi eq, %1, %156 : vector<8x1xi32>
    %158 = arith.extui %157 : vector<8x1xi1> to vector<8x1xi32>
    %159 = arith.sitofp %158 : vector<8x1xi32> to vector<8x1xf32>
    %c17 = arith.constant 17 : index
    %c0_20 = arith.constant 0 : index
    %160 = vector.load %arg2[%c17, %c0_20] : memref<20x32xf32, #tpu.memory_space<vmem>>, vector<1x32xf32>
    %161 = vector.broadcast %159 : vector<8x1xf32> to vector<8x32xf32>
    %162 = vector.broadcast %160 : vector<1x32xf32> to vector<8x32xf32>
    %163 = arith.mulf %161, %162 : vector<8x32xf32>
    %164 = arith.addf %155, %163 : vector<8x32xf32>
    %c18_i32 = arith.constant 18 : i32
    %165 = vector.broadcast %c18_i32 : i32 to vector<8x1xi32>
    %166 = arith.cmpi eq, %1, %165 : vector<8x1xi32>
    %167 = arith.extui %166 : vector<8x1xi1> to vector<8x1xi32>
    %168 = arith.sitofp %167 : vector<8x1xi32> to vector<8x1xf32>
    %c18 = arith.constant 18 : index
    %c0_21 = arith.constant 0 : index
    %169 = vector.load %arg2[%c18, %c0_21] : memref<20x32xf32, #tpu.memory_space<vmem>>, vector<1x32xf32>
    %170 = vector.broadcast %168 : vector<8x1xf32> to vector<8x32xf32>
    %171 = vector.broadcast %169 : vector<1x32xf32> to vector<8x32xf32>
    %172 = arith.mulf %170, %171 : vector<8x32xf32>
    %173 = arith.addf %164, %172 : vector<8x32xf32>
    %c19_i32 = arith.constant 19 : i32
    %174 = vector.broadcast %c19_i32 : i32 to vector<8x1xi32>
    %175 = arith.cmpi eq, %1, %174 : vector<8x1xi32>
    %176 = arith.extui %175 : vector<8x1xi1> to vector<8x1xi32>
    %177 = arith.sitofp %176 : vector<8x1xi32> to vector<8x1xf32>
    %c19 = arith.constant 19 : index
    %c0_22 = arith.constant 0 : index
    %178 = vector.load %arg2[%c19, %c0_22] : memref<20x32xf32, #tpu.memory_space<vmem>>, vector<1x32xf32>
    %179 = vector.broadcast %177 : vector<8x1xf32> to vector<8x32xf32>
    %180 = vector.broadcast %178 : vector<1x32xf32> to vector<8x32xf32>
    %181 = arith.mulf %179, %180 : vector<8x32xf32>
    %182 = arith.addf %173, %181 : vector<8x32xf32>
    %cst_23 = arith.constant dense<0.000000e+00> : vector<8xf32>
    %183 = vector.multi_reduction <add>, %182, %cst_23 [1] : vector<8x32xf32> to vector<8xf32>
    %184 = vector.shape_cast %183 : vector<8xf32> to vector<8x1xf32>
    %cst_24 = arith.constant 3.200000e+01 : f32
    %185 = vector.broadcast %cst_24 : f32 to vector<8x1xf32>
    %186 = arith.divf %184, %185 : vector<8x1xf32>
    %187 = vector.broadcast %186 : vector<8x1xf32> to vector<8x32xf32>
    %188 = arith.subf %182, %187 : vector<8x32xf32>
    %189 = arith.mulf %188, %188 : vector<8x32xf32>
    %cst_25 = arith.constant dense<0.000000e+00> : vector<8xf32>
    %190 = vector.multi_reduction <add>, %189, %cst_25 [1] : vector<8x32xf32> to vector<8xf32>
    %191 = vector.shape_cast %190 : vector<8xf32> to vector<8x1xf32>
    %cst_26 = arith.constant 3.200000e+01 : f32
    %192 = vector.broadcast %cst_26 : f32 to vector<8x1xf32>
    %193 = arith.divf %191, %192 : vector<8x1xf32>
    %cst_27 = arith.constant 9.99999974E-6 : f32
    %194 = vector.broadcast %cst_27 : f32 to vector<8x1xf32>
    %195 = arith.addf %193, %194 : vector<8x1xf32>
    %196 = math.rsqrt %195 : vector<8x1xf32>
    %197 = vector.broadcast %196 : vector<8x1xf32> to vector<8x32xf32>
    %198 = arith.mulf %188, %197 : vector<8x32xf32>
    %c0_28 = arith.constant 0 : index
    %c0_29 = arith.constant 0 : index
    %199 = vector.load %arg3[%c0_28, %c0_29] : memref<1x32xf32, #tpu.memory_space<vmem>>, vector<1x32xf32>
    %200 = vector.broadcast %199 : vector<1x32xf32> to vector<8x32xf32>
    %201 = arith.mulf %198, %200 : vector<8x32xf32>
    %c0_30 = arith.constant 0 : index
    %c0_31 = arith.constant 0 : index
    %202 = vector.load %arg4[%c0_30, %c0_31] : memref<1x32xf32, #tpu.memory_space<vmem>>, vector<1x32xf32>
    %203 = vector.broadcast %202 : vector<1x32xf32> to vector<8x32xf32>
    %204 = arith.addf %201, %203 : vector<8x32xf32>
    %205 = vector.shape_cast %204 : vector<8x32xf32> to vector<1x8x32xf32>
    %c0_32 = arith.constant 0 : index
    %c0_33 = arith.constant 0 : index
    %c0_34 = arith.constant 0 : index
    %206 = vector.load %arg5[%c0_32, %c0_33, %c0_34] : memref<1x8x32xf32, #tpu.memory_space<vmem>>, vector<1x8x32xf32>
    tpu.vector_store %arg5[%c0_32, %c0_33, %c0_34], %205 {strides = array<i32>} : memref<1x8x32xf32, #tpu.memory_space<vmem>>, vector<1x8x32xf32>,
    return
  }
  func.func @transform_0(%arg0: i32) -> (i32, i32, i32) {
    %c0_i32 = arith.constant 0 : i32
    %c0_i32_0 = arith.constant 0 : i32
    %c0_i32_1 = arith.constant 0 : i32
    return %arg0, %c0_i32, %c0_i32_0 : i32, i32, i32
  }
  func.func @transform_1(%arg0: i32) -> (i32, i32) {
    %c0_i32 = arith.constant 0 : i32
    %c0_i32_0 = arith.constant 0 : i32
    %c0_i32_1 = arith.constant 0 : i32
    return %c0_i32, %c0_i32_0 : i32, i32
  }
  func.func @transform_2(%arg0: i32) -> (i32, i32) {
    %c0_i32 = arith.constant 0 : i32
    %c0_i32_0 = arith.constant 0 : i32
    %c0_i32_1 = arith.constant 0 : i32
    return %c0_i32, %c0_i32_0 : i32, i32
  }
  func.func @transform_3(%arg0: i32) -> (i32, i32) {
    %c0_i32 = arith.constant 0 : i32
    %c0_i32_0 = arith.constant 0 : i32
    %c0_i32_1 = arith.constant 0 : i32
    return %c0_i32, %c0_i32_0 : i32, i32
  }
  func.func @transform_4(%arg0: i32) -> (i32, i32, i32) {
    %c0_i32 = arith.constant 0 : i32
    %c0_i32_0 = arith.constant 0 : i32
    %c0_i32_1 = arith.constant 0 : i32
    return %arg0, %c0_i32, %c0_i32_0 : i32, i32, i32
  }
}

</mosaic_0001>

<bundles_post_ra>
// kernel: tpu_custom_call.1
= control target key start
LH: loop header
LB: loop body
LE: loop exit
PB: predicated region body
PF: predicated region fallthrough
CT: control target
= control target key end

     0   :  { %9 = vsyncpa [#allocation3], 0  ;;  %s1014_s0 = inlined_call_operand.vmem [shape: s32[2,8,1], index: 0, kind: input, shape index: {}]   ;;  %s1015_s1 = inlined_call_operand.hbm [shape: f32[20,32], index: 1, kind: input, shape index: {}]   ;;  %s1016_s2 = inlined_call_operand.vmem [shape: f32[1,32], index: 2, kind: input, shape index: {}]   ;;  %s1017_s3 = inlined_call_operand.vmem [shape: f32[1,32], index: 3, kind: input, shape index: {}]   ;;  %s1018_s4 = inlined_call_operand.hbm [shape: f32[2,8,32], index: 4, kind: output, shape index: {}]  }
   0x1   :  { %10 = vsyncpa [#allocation4], 0 }
   0x2   :  { %12 = vsyncpa [#allocation4 + $0x1], 0  ;;  %s870_s15 = smov 0   ;;  %s872_s16 = smov 0  }
   0x3   :  { %s874_s17 = smov 0   ;;  %s876_s18 = smov 0  }
   0x4 LB: > { %s891_s19 = sadd.s32 4294967295, %s837_s18   ;;  %s626_s20 = sadd.s32 4294967294, %s837_s18   ;;  %s837_s18 = sphi %s876_s18, %s1034_s18   ;;  %s833_s17 = sphi %s874_s17, %s1033_s17   ;;  %s829_s16 = sphi %s872_s16, %s1032_s16   ;;  %s825_s15 = sphi %s870_s15, %s1031_s15  }
   0x5   : > { %s895_s21 = sadd.s32 1, %s837_s18   ;;  %s114_s22 = sadd.s32 1, %s833_s17 }
   0x6   : > { %s111_s23 = ssub.s32 %s837_s18, %s895_s21  ;;  %p124_p0 = scmp.ne.s32.totalorder %s833_s17, %s829_s16 }
   0x7   : > { %p112_p1 = scmp.eq.s32.totalorder %s111_s23, 0  ;;  %p125_p2 = scmp.eq.s32.totalorder %s891_s19, 1 }
   0x8   : > { %p130_p3 = scmp.ne.s32.totalorder %s829_s16, %s825_s15  ;;  %p131_p4 = scmp.eq.s32.totalorder %s626_s20, 1 }
   0x9   : > { %s906_s24 = scalar_select %p112_p1, %s833_s17, %s114_s22  }
   0xa   : > { %p908_p5 = por %p125_p2, %p124_p0  ;;  %p912_p6 = por %p131_p4, %p130_p3 }
   0xb   : > { %p627_p7 = scmp.ge.s32.totalorder %s837_s18, 1  ;;  %p138_p8 = scmp.lt.s32.totalorder %s837_s18, 3 }
   0xc   : > { %s1022_s25 = scalar_select %p908_p5, 1, 0 }
   0xd   : > { %s1023_s26 = scalar_select %p912_p6, 1, 0 }
   0xe   : > { %p1019_p9 = scmp.eq.s32.totalorder %s891_s19, 0  ;;  %p919_p10 = pnand %p627_p7, %p138_p8 }
   0xf   : > { %s839_s28 = smov [#allocation2]   ;;  %s743_s7 = scalar_lea.hbm %s1015_s1, 384 }
  0x10   : > { %s1024_s27 = scalar_select %p919_p10, 1, 0 }
  0x11   : > { %s150_s29 = sshll.u32 %s839_s28, 4  ;;  %p686_p11 = pneg %p919_p10  ;;  %s151_s29 = int_to_ptr.vmem [resolvable:$true] %s150_s29 }
  0x12   : > { %p744_p13 = scmp.ne.s32.totalorder %s1015_s1, %s743_s7  ;;  %p750_p3 = scmp.lt.u32.totalorder %s743_s7, %s1015_s1 }
  0x13   : > { %p927_p12 = pnand %p1019_p9, %p686_p11 }
  0x15   : > { %p745_p0 = pneg %p927_p12 }
  0x17   : > { %p746_p1 = pnand %p745_p0, %p744_p13 }
  0x19   : > { %p747_p2 = pneg %p746_p1 }
  0x1b   : > { %p752_p4 = pnand %p750_p3, %p747_p2 }
  0x1d   : > { %755 = shalt.err (!%p752_p4)
}
  0x1e   : > { %s756_s12 = scalar_lea.vmem %s151_s29, 384  ;;  %p764_p9 = scmp.lt.s32.totalorder %s151_s29, %s151_s29 }
  0x1f   : > { %p757_p7 = scmp.ne.s32.totalorder %s151_s29, %s756_s12  ;;  %p765_p6 = scmp.lt.s32.totalorder %s756_s12, %s756_s12 }
  0x21   : > { %p759_p8 = pnand %p757_p7, %p745_p0  ;;  %p766_p5 = por %p765_p6, %p764_p9 }
  0x23   : > { %p760_p11 = pneg %p759_p8 }
  0x25   : > { %p767_p10 = pnand %p766_p5, %p760_p11 }
  0x27   : > { %770 = shalt.err (!%p767_p10)
}
  0x28   : > { %s840_s13 = smov 128   ;;  %s841_s14 = smov 8  }
  0x29   : > { %689 = dma.hbm_to_vmem [thread:$0]  (!%p927_p12), %s1015_s1, 384, %s151_s29, [#allocation3], %s840_s13, %s840_s13, %s841_s14  }
  0x2a   : > { %p1026_p13 = scmp.ne.s32.totalorder %s1024_s27, 0 }
  0x2b   : > { %p1027_p1 = scmp.eq.s32.totalorder (!%p1026_p13), %s891_s19, 0 }
  0x2c   : > { %179 = sbr.rel (%p1026_p13) target bundleno = 560 (0x230), region = 36 }
  0x33   : > { %816 = dma.done.wait (%p1027_p1), [#allocation3], 384   ;;  %p1028_p0 = pmov %p1027_p1 }
  0x34   : > { %p204_p5 = scmp.lt.s32.totalorder %s891_s19, 1  ;;  %v842_v0 = vmov 0   ;;  %v843_v2 = vmov 0.0   ;;  %v635_v25 = vld [vmem:[#allocation2] ss:$0 sm:$0xff]  ;;  %s201_s27 = sand.u32 1, %s829_s16  }
  0x35   : > { %818 = vsyncadd (%p1028_p0), [#allocation3], 4294966912  ;;  %740 = vset.pattern.permute.xlu1 %v842_v0  ;;  %734 = vset.pattern.permute.xlu0 %v842_v0  ;;  %v637_v26 = vld [vmem:[#allocation2 + $0x1] ss:$0 sm:$0xff]  ;;  %v639_v31 = vld [vmem:[#allocation2 + $0x2] ss:$0 sm:$0xff] }
  0x36   : > { %s205_s23 = scalar_select %p204_p5, %s891_s19, 1  ;;  %v641_v34 = vld [vmem:[#allocation2 + $0x3] ss:$0 sm:$0xff]  ;;  %v643_v38 = vld [vmem:[#allocation2 + $0x4] ss:$0 sm:$0xff] }
  0x37   : > { %v645_v42 = vld [vmem:[#allocation2 + $0x5] ss:$0 sm:$0xff]  ;;  %v647_v46 = vld [vmem:[#allocation2 + $0x6] ss:$0 sm:$0xff]  ;;  %v649_v50 = vld [vmem:[#allocation2 + $0x7] ss:$0 sm:$0xff] }
  0x38   : > { %s633_s28 = sshll.u32 %s205_s23, 3  ;;  %v651_v54 = vld [vmem:[#allocation2 + $0x8] ss:$0 sm:$0xff]  ;;  %v653_v58 = vld [vmem:[#allocation2 + $0x9] ss:$0 sm:$0xff]  ;;  %s632_s6 = sshll.u32 %s201_s27, 3 }
  0x39   : > { %s207_s29 = scalar_lea.vmem %s1014_s0, %s633_s28  ;;  %v655_v62 = vld [vmem:[#allocation2 + $0xa] ss:$0 sm:$0xff]  ;;  %s677_s11 = sshll.u32 %s891_s19, 7 }
  0x3a   : > { %v208_v1 = vld [vmem:[%s207_s29] sm:$0xff]  ;;  %s203_s12 = scalar_lea.vmem [#allocation5], %s632_s6  ;;  %s971_s22 = scalar_lea.hbm %s1018_s4, %s677_s11 }
  0x3b   : > { %vm254_vm0 = vcmp.eq.s32.totalorder %v208_v1, 3  ;;  %vm209_vm1 = vcmp.eq.s32.totalorder %v208_v1, 0  ;;  %vm224_vm2 = vcmp.eq.s32.totalorder %v208_v1, 1  ;;  %vm269_vm3 = vcmp.eq.s32.totalorder %v208_v1, 4  ;;  %s555_s13 = sshll.u32 %s203_s12, 4  ;;  %s542_s23 = scalar_lea.sflag [#allocation4], %s201_s27  ;;  %s973_s13 = int_to_ptr.vmem [resolvable:$true] %s555_s13 }
  0x3c   : > { %v640_v3 = vsel %vm254_vm0, 1.0, %v843_v2  ;;  %v634_v4 = vsel %vm209_vm1, 1.0, %v843_v2  ;;  %v636_v5 = vsel %vm224_vm2, 1.0, %v843_v2  ;;  %vm239_vm4 = vcmp.eq.s32.totalorder %v208_v1, 2  ;;  %s771_s28 = scalar_lea.vmem %s973_s13, 128  ;;  %p1029_p9 = scmp.ne.s32.totalorder %s1022_s25, 0 }
  0x3d   : > { %260 = vperm.xlu1 %740, %v640_v3   ;;  %v735_v6 = vpack.i.bf16 %v636_v5, %v634_v4  ;;  %v642_v7 = vsel %vm269_vm3, 1.0, %v843_v2  ;;  %vm299_vm5 = vcmp.eq.s32.totalorder %v208_v1, 6  ;;  %v638_v8 = vsel %vm239_vm4, 1.0, %v843_v2  ;;  %p772_p6 = scmp.ne.s32.totalorder %s973_s13, %s771_s28  ;;  %s844_s19 = smov [#allocation5]  }
  0x3e   : > { %vm284_vm6 = vcmp.eq.s32.totalorder %v208_v1, 5  ;;  %v646_v9 = vsel %vm299_vm5, 1.0, %v843_v2  ;;  %vm329_vm7 = vcmp.eq.s32.totalorder %v208_v1, 8  ;;  %vm314_vm8 = vcmp.eq.s32.totalorder %v208_v1, 7  ;;  %s775_s30 = sshll.u32 %s844_s19, 4  ;;  %s776_s30 = int_to_ptr.vmem [resolvable:$false] %s775_s30 }
  0x3f   : > { %736 = vperm.xlu0 %734, %v735_v6   ;;  %v644_v10 = vsel %vm284_vm6, 1.0, %v843_v2  ;;  %v650_v11 = vsel %vm329_vm7, 1.0, %v843_v2  ;;  %vm359_vm9 = vcmp.eq.s32.totalorder %v208_v1, 10  ;;  %v648_v12 = vsel %vm314_vm8, 1.0, %v843_v2  ;;  %v659_v6 = vld [vmem:[#allocation2 + $0xc] ss:$0 sm:$0xff]  ;;  %p773_p10 = pnand %p772_p6, %p1029_p9  ;;  %p778_p2 = scmp.lt.s32.totalorder %s973_s13, %s776_s30 }
  0x40   : > { %vm344_vm10 = vcmp.eq.s32.totalorder %v208_v1, 9  ;;  %v654_v13 = vsel %vm359_vm9, 1.0, %v843_v2  ;;  %vm389_vm11 = vcmp.eq.s32.totalorder %v208_v1, 12  ;;  %vm374_vm12 = vcmp.eq.s32.totalorder %v208_v1, 11  ;;  %s777_s5 = scalar_lea.vmem %s776_s30, 256 }
  0x41   : > { %275 = vperm.xlu1 %740, %v642_v7   ;;  %v652_v14 = vsel %vm344_vm10, 1.0, %v843_v2  ;;  %v658_v15 = vsel %vm389_vm11, 1.0, %v843_v2  ;;  %vm419_vm13 = vcmp.eq.s32.totalorder %v208_v1, 14  ;;  %v656_v16 = vsel %vm374_vm12, 1.0, %v843_v2  ;;  %p774_p12 = pneg %p773_p10  ;;  %p779_p3 = scmp.lt.s32.totalorder %s777_s5, %s771_s28 }
  0x42   : > { %vm404_vm14 = vcmp.eq.s32.totalorder %v208_v1, 13  ;;  %v662_v17 = vsel %vm419_vm13, 1.0, %v843_v2  ;;  %vm449_vm15 = vcmp.eq.s32.totalorder %v208_v1, 16  ;;  %vm434_vm0 = vcmp.eq.s32.totalorder %v208_v1, 15 }
  0x43   : > { %245 = vperm.xlu0 %734, %v638_v8   ;;  %v660_v18 = vsel %vm404_vm14, 1.0, %v843_v2  ;;  %v666_v19 = vsel %vm449_vm15, 1.0, %v843_v2  ;;  %vm479_vm1 = vcmp.eq.s32.totalorder %v208_v1, 18  ;;  %v664_v20 = vsel %vm434_vm0, 1.0, %v843_v2  ;;  %p780_p4 = por %p779_p3, %p778_p2 }
  0x44   : > { %vm464_vm2 = vcmp.eq.s32.totalorder %v208_v1, 17  ;;  %v670_v21 = vsel %vm479_vm1, 1.0, %v843_v2  ;;  %vm494_vm3 = vcmp.eq.s32.totalorder %v208_v1, 19  ;;  %vm509_vm4 = vcmask 261120  }
  0x45   : > { %305 = vperm.xlu1 %740, %v646_v9   ;;  %v668_v22 = vsel %vm464_vm2, 1.0, %v843_v2  ;;  %v672_v23 = vsel %vm494_vm3, 1.0, %v843_v2  ;;  %v657_v2 = vld [vmem:[#allocation2 + $0xb] ss:$0 sm:$0xff]  ;;  %p781_p7 = pnand %p780_p4, %p774_p12 }
  0x47   : > { %290 = vperm.xlu0 %734, %v644_v10   ;;  %v661_v10 = vld [vmem:[#allocation2 + $0xd] ss:$0 sm:$0xff] }
  0x49   : > { %335 = vperm.xlu1 %740, %v650_v11  }
  0x4b   : > { %320 = vperm.xlu0 %734, %v648_v12  }
  0x4d   : > { %365 = vperm.xlu1 %740, %v654_v13  }
  0x4f   : > { %350 = vperm.xlu0 %734, %v652_v14   ;;  %v663_v14 = vld [vmem:[#allocation2 + $0xe] ss:$0 sm:$0xff] }
  0x51   : > { %395 = vperm.xlu1 %740, %v658_v15  }
  0x53   : > { %380 = vperm.xlu0 %734, %v656_v16  }
  0x55   : > { %425 = vperm.xlu1 %740, %v662_v17  }
  0x57   : > { %410 = vperm.xlu0 %734, %v660_v18   ;;  %v665_v18 = vld [vmem:[#allocation2 + $0xf] ss:$0 sm:$0xff] }
  0x59   : > { %455 = vperm.xlu1 %740, %v666_v19  }
  0x5b   : > { %440 = vperm.xlu0 %734, %v664_v20  }
  0x5d   : > { %485 = vperm.xlu1 %740, %v670_v21  }
  0x5f   : > { %470 = vperm.xlu0 %734, %v668_v22   ;;  %v667_v22 = vld [vmem:[#allocation2 + $0x10] ss:$0 sm:$0xff] }
  0x63   : > { %500 = vperm.xlu0 %734, %v672_v23  }
  0xbc   : > { %v261_v24 = vpop.permute.xlu1 %260 }
  0xbd   : > { %v267_v40 = vmul.f32 %v641_v34, %v261_v24 }
  0xbe   : > { %v737_v27 = vpop.permute.xlu0 %736 }
  0xbf   : > { %v739_v28 = vunpack.i.h.bf16 %v737_v27  ;;  %v738_v29 = vunpack.i.l.bf16 %v737_v27 }
  0xc0   : > { %v276_v30 = vpop.permute.xlu1 %275 }
  0xc1   : > { %v237_v32 = vmul.f32 %v739_v28, %v637_v26  ;;  %v222_v33 = vmul.f32 %v738_v29, %v635_v25  ;;  %v282_v44 = vmul.f32 %v643_v38, %v276_v30  ;;  %v669_v25 = vld [vmem:[#allocation2 + $0x11] ss:$0 sm:$0xff]  ;;  %v671_v29 = vld [vmem:[#allocation2 + $0x12] ss:$0 sm:$0xff] }
  0xc2   : > { %v246_v35 = vpop.permute.xlu0 %245 }
  0xc3   : > { %v238_v36 = vadd.f32 %v237_v32, %v222_v33  ;;  %v252_v37 = vmul.f32 %v639_v31, %v246_v35  ;;  %v673_v33 = vld [vmem:[#allocation2 + $0x13] ss:$0 sm:$0xff] }
  0xc4   : > { %v306_v39 = vpop.permute.xlu1 %305 }
  0xc5   : > { %v253_v41 = vadd.f32 %v252_v37, %v238_v36  ;;  %v312_v52 = vmul.f32 %v647_v46, %v306_v39 }
  0xc6   : > { %v291_v43 = vpop.permute.xlu0 %290 }
  0xc7   : > { %v268_v45 = vadd.f32 %v267_v40, %v253_v41  ;;  %v297_v49 = vmul.f32 %v645_v42, %v291_v43 }
  0xc8   : > { %v336_v47 = vpop.permute.xlu1 %335 }
  0xc9   : > { %v283_v48 = vadd.f32 %v282_v44, %v268_v45  ;;  %v342_v60 = vmul.f32 %v651_v54, %v336_v47 }
  0xca   : > { %v321_v51 = vpop.permute.xlu0 %320 }
  0xcb   : > { %v298_v53 = vadd.f32 %v297_v49, %v283_v48  ;;  %v327_v57 = vmul.f32 %v649_v50, %v321_v51  ;;  %v674_v50 = vld [vmem:[%s1016_s2] ss:$0 sm:$0xff] }
  0xcc   : > { %v366_v55 = vpop.permute.xlu1 %365 }
  0xcd   : > { %v313_v56 = vadd.f32 %v312_v52, %v298_v53  ;;  %v372_v4 = vmul.f32 %v655_v62, %v366_v55  ;;  %v675_v52 = vld [vmem:[%s1017_s3] ss:$0 sm:$0xff] }
  0xce   : > { %v351_v59 = vpop.permute.xlu0 %350 }
  0xcf   : > { %v328_v61 = vadd.f32 %v327_v57, %v313_v56  ;;  %v357_v1 = vmul.f32 %v653_v58, %v351_v59 }
  0xd0   : > { %v396_v63 = vpop.permute.xlu1 %395 }
  0xd1   : > { %v343_v0 = vadd.f32 %v342_v60, %v328_v61  ;;  %v402_v12 = vmul.f32 %v659_v6, %v396_v63 }
  0xd2   : > { %v381_v3 = vpop.permute.xlu0 %380 }
  0xd3   : > { %v358_v5 = vadd.f32 %v357_v1, %v343_v0  ;;  %v387_v9 = vmul.f32 %v657_v2, %v381_v3 }
  0xd4   : > { %v426_v7 = vpop.permute.xlu1 %425 }
  0xd5   : > { %v373_v8 = vadd.f32 %v372_v4, %v358_v5  ;;  %v432_v20 = vmul.f32 %v663_v14, %v426_v7 }
  0xd6   : > { %v411_v11 = vpop.permute.xlu0 %410 }
  0xd7   : > { %v388_v13 = vadd.f32 %v387_v9, %v373_v8  ;;  %v417_v16 = vmul.f32 %v661_v10, %v411_v11 }
  0xd8   : > { %v456_v17 = vpop.permute.xlu1 %455 }
  0xd9   : > { %v403_v15 = vadd.f32 %v402_v12, %v388_v13  ;;  %v462_v27 = vmul.f32 %v667_v22, %v456_v17 }
  0xda   : > { %v441_v19 = vpop.permute.xlu0 %440 }
  0xdb   : > { %v418_v21 = vadd.f32 %v417_v16, %v403_v15  ;;  %v447_v24 = vmul.f32 %v665_v18, %v441_v19 }
  0xdc   : > { %v486_v30 = vpop.permute.xlu1 %485 }
  0xdd   : > { %v433_v23 = vadd.f32 %v432_v20, %v418_v21  ;;  %v492_v35 = vmul.f32 %v671_v29, %v486_v30 }
  0xde   : > { %v471_v26 = vpop.permute.xlu0 %470 }
  0xdf   : > { %v448_v28 = vadd.f32 %v447_v24, %v433_v23  ;;  %v477_v32 = vmul.f32 %v669_v25, %v471_v26 }
  0xe1   : > { %v463_v31 = vadd.f32 %v462_v27, %v448_v28 }
  0xe2   : > { %v501_v34 = vpop.permute.xlu0 %500 }
  0xe3   : > { %v478_v36 = vadd.f32 %v477_v32, %v463_v31  ;;  %v507_v37 = vmul.f32 %v673_v33, %v501_v34 }
  0xe5   : > { %v493_v38 = vadd.f32 %v492_v35, %v478_v36 }
  0xe7   : > { %v508_v39 = vadd.f32 %v507_v37, %v493_v38 }
  0xe9   : > { %v510_v40 = vsel %vm509_vm4, %v508_v39, 0.0 }
  0xea   : > { %511 = vadd.xlane.f32.xlu1 %v510_v40 }
 0x177   : > { %v512_v41 = vpop.xlane.xlu1 %511 }
 0x178   : > { %v514_v42 = vmul.f32 0.03125, %v512_v41 }
 0x17a   : > { %v515_v43 = vsub.f32 %v508_v39, %v514_v42 }
 0x17c   : > { %v516_v44 = vmul.f32 %v515_v43, %v515_v43 }
 0x17e   : > { %v517_v45 = vsel %vm509_vm4, %v516_v44, 0.0 }
 0x17f   : > { %518 = vadd.xlane.f32.xlu0 %v517_v45 }
 0x20c   : > { %v519_v46 = vpop.xlane.xlu0 %518 }
 0x20d   : > { %v520_v47 = vmul.f32 0.03125, %v519_v46 }
 0x20f   : > { %v521_v48 = vadd.f32 1e-05, %v520_v47 }
 0x211   : > { %741 = vrsqrt.f32 %v521_v48 }
 0x21b   : > { %v742_v49 = vpop.eup %741 }
 0x21c   : > { %v523_v51 = vmul.f32 %v742_v49, %v515_v43 }
 0x21e   : > { %v531_v53 = vmul.f32 %v674_v50, %v523_v51 }
 0x220   : > { %v539_v54 = vadd.f32 %v675_v52, %v531_v53 }
 0x222   : > { %540 = vst.msk [vmem:[%s203_s12] sm:$0xff] %vm509_vm4, %v539_v54 }
 0x223   : > { %784 = shalt.err (!%p781_p7)
}
 0x224   : > { %s785_s29 = scalar_lea.hbm %s971_s22, 128  ;;  %s789_s7 = scalar_lea.hbm %s1018_s4, 256 }
 0x225   : > { %p786_p8 = scmp.ne.s32.totalorder %s971_s22, %s785_s29  ;;  %p790_p1 = scmp.lt.u32.totalorder %s971_s22, %s1018_s4 }
 0x226   : > { %p791_p0 = scmp.lt.u32.totalorder %s789_s7, %s785_s29  ;;  %p793_p6 = scmp.lt.u32.totalorder %s785_s29, %s971_s22 }
 0x227   : > { %p787_p11 = pnand %p786_p8, %p1029_p9 }
 0x228   : > { %p792_p5 = por %p791_p0, %p790_p1 }
 0x229   : > { %p788_p13 = pneg %p787_p11 }
 0x22a   : > { %p794_p10 = por %p793_p6, %p792_p5 }
 0x22c   : > { %p795_p12 = pnand %p794_p10, %p788_p13 }
 0x22e   : > { %798 = shalt.err (!%p795_p12)
}
 0x22f   : > { %684 = dma.vmem_to_hbm [thread:$0]  (%p1029_p9), %s973_s13, 128, %s971_s22, %s542_s23  }
 0x230 PF: > { %p696_p2 = scmp.ge.s32.totalorder %s837_s18, 2  ;;  %s567_s10 = sand.u32 1, %s825_s15  }
 0x231   : > { %p1030_p3 = scmp.ne.s32.totalorder %s1023_s26, 0  ;;  %s568_s11 = scalar_lea.sflag [#allocation4], %s567_s10 }
 0x233   : > { %p691_p4 = pnand %p696_p2, %p1030_p3 }
 0x235   : > { %820 = dma.done.wait (!%p691_p4), %s568_s11, 128  }
 0x236   : > { %822 = vsyncadd (!%p691_p4), %s568_s11, 4294967168  ;;  %p15_p7 = scmp.ge.s32.totalorder %s895_s21, 4   ;;  %s1031_s15 = smov %s829_s16 }
 0x237   : > { %s1032_s16 = smov %s833_s17  ;;  %s1033_s17 = smov %s906_s24 }
 0x238   : > { %s1034_s18 = smov %s895_s21  ;;  %17 = sbr.rel (!%p15_p7) target bundleno = 4 (0x4), region = 76 }
 0x23f   :  { %573 = vsyncpa [#allocation3], 1 }
 0x240   :  { %575 = vsyncpa [#allocation3 + $0x1], 1 }
 0x241   :  { %576 = vsyncpa [#allocation4], 1 }
 0x242   :  { %578 = vsyncpa [#allocation4 + $0x1], 1 }

</bundles_post_ra>
